<compile_context>
chip_gen: v6e
topology: v6e:2x2x1
jax: 0.10.0
libtpu: 0.0.40
codegen_flags: <defaults>
</compile_context>

<pallas_src>
import functools

import jax
import jax.numpy as jnp
from jax.experimental import pallas as pl
from jax.experimental.pallas import tpu as pltpu


def _ae_kernel(x_ref, w1_ref, b1_ref, w2_ref, b2_ref, o_ref):
    # encoder: Linear + ReLU  (accumulate in f32 on the MXU)
    h = jnp.dot(x_ref[...], w1_ref[...], preferred_element_type=jnp.float32)
    h = jnp.maximum(h + b1_ref[...], 0.0)
    # decoder: Linear + Sigmoid
    # (astype is a no-op for f32; for bf16 it is the intentional f32->bf16
    #  cast so the MXU sees packed operands instead of widened w2)
    y = jnp.dot(h.astype(w2_ref.dtype), w2_ref[...],
                preferred_element_type=jnp.float32)
    y = y + b2_ref[...]
    o_ref[...] = jax.nn.sigmoid(y).astype(o_ref.dtype)


@functools.partial(jax.jit, static_argnames=("block_rows", "compute_dtype"))
def autoencoder_forward(x, w1, b1, w2, b2, *, block_rows=512,
                        compute_dtype=None):
    """x: [B, D_in]; w1: [D_in, H]; b1: [H]; w2: [H, D_in]; b2: [D_in].
    Returns sigmoid(relu(x @ w1 + b1) @ w2 + b2), shape [B, D_in], x.dtype."""
    B, D_in = x.shape
    H = w1.shape[1]
    assert w1.shape == (D_in, H) and w2.shape == (H, D_in)
    assert b1.shape == (H,) and b2.shape == (D_in,)

    out_dtype = x.dtype
    if compute_dtype is None:
        compute_dtype = x.dtype

    LANE, SUB = 128, 8
    # Lane-dense feature width: 784 -> 896 (= 7 * 128). All loads/stores of
    # x and out become unmasked full-vreg accesses.
    D_pad = pl.cdiv(D_in, LANE) * LANE

    # Sublane-aligned batch, rounded up to a whole number of tiles.
    B_pad = pl.cdiv(B, SUB) * SUB
    TB = min(block_rows, B_pad)
    B_pad = pl.cdiv(B_pad, TB) * TB
    grid = (B_pad // TB,)

    # Zero-pad operands to the dense shapes (padding rows/cols are inert:
    # extra x cols hit zero w1 rows, extra output cols get sliced off).
    x_p = jnp.zeros((B_pad, D_pad), compute_dtype)
    x_p = x_p.at[:B, :D_in].set(x.astype(compute_dtype))
    w1_p = jnp.zeros((D_pad, H), compute_dtype)
    w1_p = w1_p.at[:D_in, :].set(w1.astype(compute_dtype))
    w2_p = jnp.zeros((H, D_pad), compute_dtype)
    w2_p = w2_p.at[:, :D_in].set(w2.astype(compute_dtype))
    b1_p = b1.reshape(1, H).astype(jnp.float32)
    b2_p = jnp.zeros((1, D_pad), jnp.float32)
    b2_p = b2_p.at[0, :D_in].set(b2.astype(jnp.float32))

    out = pl.pallas_call(
        _ae_kernel,
        out_shape=jax.ShapeDtypeStruct((B_pad, D_pad), out_dtype),
        grid=grid,
        in_specs=[
            pl.BlockSpec((TB, D_pad), lambda i: (i, 0)),   # x tile (pipelined)
            pl.BlockSpec((D_pad, H), lambda i: (0, 0)),    # w1 resident
            pl.BlockSpec((1, H), lambda i: (0, 0)),        # b1 resident
            pl.BlockSpec((H, D_pad), lambda i: (0, 0)),    # w2 resident
            pl.BlockSpec((1, D_pad), lambda i: (0, 0)),    # b2 resident
        ],
        out_specs=pl.BlockSpec((TB, D_pad), lambda i: (i, 0)),
        compiler_params=pltpu.CompilerParams(
            dimension_semantics=("parallel",)),
    )(x_p, w1_p, b1_p, w2_p, b2_p)

    return out[:B, :D_in]


def _reference(x, w1, b1, w2, b2):
    h = jnp.maximum(x @ w1 + b1, 0.0)
    return jax.nn.sigmoid(h @ w2 + b2)


if __name__ == "__main__":
    B, D_IN, HID = 8, 784, 32  # MNIST: 28*28 = 784 flattened features

    key = jax.random.PRNGKey(0)
    kx, k1, k2, k3, k4 = jax.random.split(key, 5)

    x = jax.random.uniform(kx, (B, D_IN), dtype=jnp.float32)  # image-like [0,1)

    # PyTorch-Linear-style init: U(-1/sqrt(fan_in), 1/sqrt(fan_in))
    s1 = 1.0 / (D_IN ** 0.5)
    s2 = 1.0 / (HID ** 0.5)
    w1 = jax.random.uniform(k1, (D_IN, HID), jnp.float32, -s1, s1)
    b1 = jax.random.uniform(k2, (HID,), jnp.float32, -s1, s1)
    w2 = jax.random.uniform(k3, (HID, D_IN), jnp.float32, -s2, s2)
    b2 = jax.random.uniform(k4, (D_IN,), jnp.float32, -s2, s2)

    ref = _reference(x, w1, b1, w2, b2)

    # 1) f32 path (strict tolerance)
    out = jax.block_until_ready(autoencoder_forward(x, w1, b1, w2, b2))
    assert out.shape == (B, D_IN) and out.dtype == jnp.float32
    assert jnp.allclose(out, ref, atol=1e-5, rtol=1e-5), "f32 mismatch vs ref"

    # 2) multi-tile batch grid (grid > 1) correctness
    x_big = jnp.tile(x, (4, 1))                        # B = 32
    out_big = jax.block_until_ready(
        autoencoder_forward(x_big, w1, b1, w2, b2, block_rows=8))
    assert out_big.shape == (4 * B, D_IN)
    assert jnp.allclose(out_big, jnp.tile(ref, (4, 1)), atol=1e-5, rtol=1e-5)

    # 3) bf16 inputs / f32 accumulation path (looser tolerance)
    out_bf16 = jax.block_until_ready(
        autoencoder_forward(x, w1, b1, w2, b2, compute_dtype=jnp.bfloat16))
    assert out_bf16.shape == (B, D_IN) and out_bf16.dtype == jnp.float32
    assert jnp.allclose(out_bf16, ref, atol=5e-2), "bf16 mismatch vs ref"

    print("KERNEL_OK")
</pallas_src>

<mosaic_0001>
module attributes {stable_mosaic.version = 11 : i64} {
  func.func @_ae_kernel(%arg0: i32, %arg1: memref<8x896xf32, #tpu.memory_space<vmem>>, %arg2: memref<896x32xf32, #tpu.memory_space<vmem>>, %arg3: memref<1x32xf32, #tpu.memory_space<vmem>>, %arg4: memref<32x896xf32, #tpu.memory_space<vmem>>, %arg5: memref<1x896xf32, #tpu.memory_space<vmem>>, %arg6: memref<8x896xf32, #tpu.memory_space<vmem>>) attributes {dimension_semantics = [#tpu.dimension_semantics<parallel>], iteration_bounds = array<i64: 1>, scalar_prefetch = 0 : i64, scratch_operands = 0 : i64, tpu.core_type = #tpu.core_type<tc>, window_params = [{transform_indices = @transform_0, window_bounds = array<i64: 8, 896>}, {pipeline_mode = #tpu.pipeline_mode<synchronous>, transform_indices = @transform_1, window_bounds = array<i64: 896, 32>}, {pipeline_mode = #tpu.pipeline_mode<synchronous>, transform_indices = @transform_2, window_bounds = array<i64: 1, 32>}, {pipeline_mode = #tpu.pipeline_mode<synchronous>, transform_indices = @transform_3, window_bounds = array<i64: 32, 896>}, {pipeline_mode = #tpu.pipeline_mode<synchronous>, transform_indices = @transform_4, window_bounds = array<i64: 1, 896>}, {transform_indices = @transform_5, window_bounds = array<i64: 8, 896>}]} {
    %c0 = arith.constant 0 : index
    %c0_0 = arith.constant 0 : index
    %0 = vector.load %arg1[%c0, %c0_0] : memref<8x896xf32, #tpu.memory_space<vmem>>, vector<8x896xf32>
    %c0_1 = arith.constant 0 : index
    %c0_2 = arith.constant 0 : index
    %1 = vector.load %arg2[%c0_1, %c0_2] : memref<896x32xf32, #tpu.memory_space<vmem>>, vector<896x32xf32>
    %cst = arith.constant dense<0.000000e+00> : vector<8x32xf32>
    %2 = tpu.matmul %0, %1, %cst {dimension_numbers = #tpu.dot_dimension_numbers<[1], [0], [0], [1], [0, 0, 1, 1], [], []>} : vector<8x896xf32>, vector<896x32xf32>, vector<8x32xf32> -> vector<8x32xf32>
    %c0_3 = arith.constant 0 : index
    %c0_4 = arith.constant 0 : index
    %3 = vector.load %arg3[%c0_3, %c0_4] : memref<1x32xf32, #tpu.memory_space<vmem>>, vector<1x32xf32>
    %4 = vector.broadcast %3 : vector<1x32xf32> to vector<8x32xf32>
    %5 = arith.addf %2, %4 : vector<8x32xf32>
    %cst_5 = arith.constant 0.000000e+00 : f32
    %6 = vector.broadcast %cst_5 : f32 to vector<8x32xf32>
    %7 = arith.maximumf %5, %6 : vector<8x32xf32>
    %c0_6 = arith.constant 0 : index
    %c0_7 = arith.constant 0 : index
    %8 = vector.load %arg4[%c0_6, %c0_7] : memref<32x896xf32, #tpu.memory_space<vmem>>, vector<32x896xf32>
    %cst_8 = arith.constant dense<0.000000e+00> : vector<8x896xf32>
    %9 = tpu.matmul %7, %8, %cst_8 {dimension_numbers = #tpu.dot_dimension_numbers<[1], [0], [0], [1], [0, 0, 1, 1], [], []>} : vector<8x32xf32>, vector<32x896xf32>, vector<8x896xf32> -> vector<8x896xf32>
    %c0_9 = arith.constant 0 : index
    %c0_10 = arith.constant 0 : index
    %10 = vector.load %arg5[%c0_9, %c0_10] : memref<1x896xf32, #tpu.memory_space<vmem>>, vector<1x896xf32>
    %11 = vector.broadcast %10 : vector<1x896xf32> to vector<8x896xf32>
    %12 = arith.addf %9, %11 : vector<8x896xf32>
    %13 = arith.negf %12 : vector<8x896xf32>
    %14 = math.exp %13 : vector<8x896xf32>
    %cst_11 = arith.constant 1.000000e+00 : f32
    %15 = vector.broadcast %cst_11 : f32 to vector<8x896xf32>
    %16 = arith.addf %15, %14 : vector<8x896xf32>
    %17 = arith.divf %15, %16 : vector<8x896xf32>
    %c0_12 = arith.constant 0 : index
    %c0_13 = arith.constant 0 : index
    %18 = vector.load %arg6[%c0_12, %c0_13] : memref<8x896xf32, #tpu.memory_space<vmem>>, vector<8x896xf32>
    tpu.vector_store %arg6[%c0_12, %c0_13], %17 {strides = array<i32>} : memref<8x896xf32, #tpu.memory_space<vmem>>, vector<8x896xf32>,
    return
  }
  func.func @transform_0(%arg0: i32) -> (i32, i32) {
    %c0_i32 = arith.constant 0 : i32
    %c0_i32_0 = arith.constant 0 : i32
    return %arg0, %c0_i32 : i32, i32
  }
  func.func @transform_1(%arg0: i32) -> (i32, i32) {
    %c0_i32 = arith.constant 0 : i32
    %c0_i32_0 = arith.constant 0 : i32
    %c0_i32_1 = arith.constant 0 : i32
    return %c0_i32, %c0_i32_0 : i32, i32
  }
  func.func @transform_2(%arg0: i32) -> (i32, i32) {
    %c0_i32 = arith.constant 0 : i32
    %c0_i32_0 = arith.constant 0 : i32
    %c0_i32_1 = arith.constant 0 : i32
    return %c0_i32, %c0_i32_0 : i32, i32
  }
  func.func @transform_3(%arg0: i32) -> (i32, i32) {
    %c0_i32 = arith.constant 0 : i32
    %c0_i32_0 = arith.constant 0 : i32
    %c0_i32_1 = arith.constant 0 : i32
    return %c0_i32, %c0_i32_0 : i32, i32
  }
  func.func @transform_4(%arg0: i32) -> (i32, i32) {
    %c0_i32 = arith.constant 0 : i32
    %c0_i32_0 = arith.constant 0 : i32
    %c0_i32_1 = arith.constant 0 : i32
    return %c0_i32, %c0_i32_0 : i32, i32
  }
  func.func @transform_5(%arg0: i32) -> (i32, i32) {
    %c0_i32 = arith.constant 0 : i32
    %c0_i32_0 = arith.constant 0 : i32
    return %arg0, %c0_i32 : i32, i32
  }
}

</mosaic_0001>

<bundles_post_ra>
// kernel: autoencoder_forward.1
= control target key start
LH: loop header
LB: loop body
LE: loop exit
PB: predicated region body
PF: predicated region fallthrough
CT: control target
= control target key end

     0   :  { %s1595_s0 = inlined_call_operand.vmem [shape: f32[8,896], index: 0, kind: input, shape index: {}]   ;;  %s1596_s1 = inlined_call_operand.vmem [shape: f32[896,32], index: 1, kind: input, shape index: {}]   ;;  %s1597_s2 = inlined_call_operand.vmem [shape: f32[1,32], index: 2, kind: input, shape index: {}]   ;;  %s1598_s3 = inlined_call_operand.vmem [shape: f32[32,896], index: 3, kind: input, shape index: {}]   ;;  %s1599_s4 = inlined_call_operand.vmem [shape: f32[1,896], index: 4, kind: input, shape index: {}]   ;;  %s1600_s5 = inlined_call_operand.hbm [shape: f32[8,896], index: 5, kind: output, shape index: {}]  }
   0x1   :  { %v59_v0 = vld [vmem:[%s1596_s1 + $0xf8] sm:$0xff]  ;;  %v58_v2 = vld [vmem:[%s1596_s1 + $0xf0] sm:$0xff]  ;;  %v57_v6 = vld [vmem:[%s1596_s1 + $0xe8] sm:$0xff] }
   0x2   :  { %v43_v1 = vld [vmem:[%s1596_s1 + $0x78] sm:$0xff]  ;;  %855 = vmatprep.subr.mxu0 %v59_v0  ;;  %v42_v4 = vld [vmem:[%s1596_s1 + $0x70] sm:$0xff]  ;;  %v41_v8 = vld [vmem:[%s1596_s1 + $0x68] sm:$0xff] }
   0x3   :  { %v91_v3 = vld [vmem:[%s1596_s1 + $0x1f8] sm:$0xff]  ;;  %856 = vmatpush3.msra.mxu0 %v43_v1  ;;  %v90_v7 = vld [vmem:[%s1596_s1 + $0x1f0] sm:$0xff]  ;;  %v89_v10 = vld [vmem:[%s1596_s1 + $0x1e8] sm:$0xff] }
   0x4   :  { %v75_v5 = vld [vmem:[%s1596_s1 + $0x178] sm:$0xff]  ;;  %890 = vmatprep.subr.mxu1 %v91_v3  ;;  %857 = vmatprep.subr.mxu0 %v58_v2  ;;  %v74_v9 = vld [vmem:[%s1596_s1 + $0x170] sm:$0xff]  ;;  %v56_v11 = vld [vmem:[%s1596_s1 + $0xe0] sm:$0xff] }
   0x5   :  { %891 = vmatpush3.msra.mxu1 %v75_v5  ;;  %858 = vmatpush3.msra.mxu0 %v42_v4  ;;  %v73_v12 = vld [vmem:[%s1596_s1 + $0x168] sm:$0xff]  ;;  %v40_v13 = vld [vmem:[%s1596_s1 + $0x60] sm:$0xff]  ;;  %v55_v15 = vld [vmem:[%s1596_s1 + $0xd8] sm:$0xff] }
   0x6   :  { %892 = vmatprep.subr.mxu1 %v90_v7  ;;  %859 = vmatprep.subr.mxu0 %v57_v6  ;;  %v88_v14 = vld [vmem:[%s1596_s1 + $0x1e0] sm:$0xff]  ;;  %v39_v17 = vld [vmem:[%s1596_s1 + $0x58] sm:$0xff]  ;;  %v54_v19 = vld [vmem:[%s1596_s1 + $0xd0] sm:$0xff] }
   0x7   :  { %893 = vmatpush3.msra.mxu1 %v74_v9  ;;  %860 = vmatpush3.msra.mxu0 %v41_v8  ;;  %v72_v16 = vld [vmem:[%s1596_s1 + $0x160] sm:$0xff]  ;;  %v87_v18 = vld [vmem:[%s1596_s1 + $0x1d8] sm:$0xff]  ;;  %v38_v21 = vld [vmem:[%s1596_s1 + $0x50] sm:$0xff] }
   0x8   :  { %894 = vmatprep.subr.mxu1 %v89_v10  ;;  %861 = vmatprep.subr.mxu0 %v56_v11  ;;  %v71_v20 = vld [vmem:[%s1596_s1 + $0x158] sm:$0xff]  ;;  %v86_v22 = vld [vmem:[%s1596_s1 + $0x1d0] sm:$0xff]  ;;  %v53_v23 = vld [vmem:[%s1596_s1 + $0xc8] sm:$0xff]  ;;  %v1081_v11 = vmov 0.0  }
   0x9   :  { %895 = vmatpush3.msra.mxu1 %v73_v12  ;;  %862 = vmatpush3.msra.mxu0 %v40_v13  ;;  %v70_v24 = vld [vmem:[%s1596_s1 + $0x150] sm:$0xff]  ;;  %v37_v25 = vld [vmem:[%s1596_s1 + $0x48] sm:$0xff]  ;;  %v52_v27 = vld [vmem:[%s1596_s1 + $0xc0] sm:$0xff] }
   0xa   :  { %896 = vmatprep.subr.mxu1 %v88_v14  ;;  %863 = vmatprep.subr.mxu0 %v55_v15  ;;  %v85_v26 = vld [vmem:[%s1596_s1 + $0x1c8] sm:$0xff]  ;;  %v36_v29 = vld [vmem:[%s1596_s1 + $0x40] sm:$0xff]  ;;  %v51_v31 = vld [vmem:[%s1596_s1 + $0xb8] sm:$0xff] }
   0xb   :  { %897 = vmatpush3.msra.mxu1 %v72_v16  ;;  %864 = vmatpush3.msra.mxu0 %v39_v17  ;;  %v69_v28 = vld [vmem:[%s1596_s1 + $0x148] sm:$0xff]  ;;  %v84_v30 = vld [vmem:[%s1596_s1 + $0x1c0] sm:$0xff]  ;;  %v35_v33 = vld [vmem:[%s1596_s1 + $0x38] sm:$0xff] }
   0xc   :  { %898 = vmatprep.subr.mxu1 %v87_v18  ;;  %865 = vmatprep.subr.mxu0 %v54_v19  ;;  %v68_v32 = vld [vmem:[%s1596_s1 + $0x140] sm:$0xff]  ;;  %v83_v34 = vld [vmem:[%s1596_s1 + $0x1b8] sm:$0xff]  ;;  %v50_v35 = vld [vmem:[%s1596_s1 + $0xb0] sm:$0xff] }
   0xd   :  { %899 = vmatpush3.msra.mxu1 %v71_v20  ;;  %866 = vmatpush3.msra.mxu0 %v38_v21  ;;  %v67_v36 = vld [vmem:[%s1596_s1 + $0x138] sm:$0xff]  ;;  %v34_v37 = vld [vmem:[%s1596_s1 + $0x30] sm:$0xff]  ;;  %v49_v39 = vld [vmem:[%s1596_s1 + $0xa8] sm:$0xff] }
   0xe   :  { %900 = vmatprep.subr.mxu1 %v86_v22  ;;  %867 = vmatprep.subr.mxu0 %v53_v23  ;;  %v82_v38 = vld [vmem:[%s1596_s1 + $0x1b0] sm:$0xff]  ;;  %v33_v41 = vld [vmem:[%s1596_s1 + $0x28] sm:$0xff]  ;;  %v48_v43 = vld [vmem:[%s1596_s1 + $0xa0] sm:$0xff] }
   0xf   :  { %901 = vmatpush3.msra.mxu1 %v70_v24  ;;  %868 = vmatpush3.msra.mxu0 %v37_v25  ;;  %v66_v40 = vld [vmem:[%s1596_s1 + $0x130] sm:$0xff]  ;;  %v81_v42 = vld [vmem:[%s1596_s1 + $0x1a8] sm:$0xff]  ;;  %v32_v45 = vld [vmem:[%s1596_s1 + $0x20] sm:$0xff] }
  0x10   :  { %902 = vmatprep.subr.mxu1 %v85_v26  ;;  %869 = vmatprep.subr.mxu0 %v52_v27  ;;  %v65_v44 = vld [vmem:[%s1596_s1 + $0x128] sm:$0xff]  ;;  %v80_v46 = vld [vmem:[%s1596_s1 + $0x1a0] sm:$0xff]  ;;  %v47_v47 = vld [vmem:[%s1596_s1 + $0x98] sm:$0xff] }
  0x11   :  { %903 = vmatpush3.msra.mxu1 %v69_v28  ;;  %870 = vmatpush3.msra.mxu0 %v36_v29  ;;  %v64_v48 = vld [vmem:[%s1596_s1 + $0x120] sm:$0xff]  ;;  %v31_v49 = vld [vmem:[%s1596_s1 + $0x18] sm:$0xff]  ;;  %v46_v51 = vld [vmem:[%s1596_s1 + $0x90] sm:$0xff] }
  0x12   :  { %904 = vmatprep.subr.mxu1 %v84_v30  ;;  %871 = vmatprep.subr.mxu0 %v51_v31  ;;  %v79_v50 = vld [vmem:[%s1596_s1 + $0x198] sm:$0xff]  ;;  %v30_v53 = vld [vmem:[%s1596_s1 + $0x10] sm:$0xff]  ;;  %v45_v55 = vld [vmem:[%s1596_s1 + $0x88] sm:$0xff] }
  0x13   :  { %905 = vmatpush3.msra.mxu1 %v68_v32  ;;  %872 = vmatpush3.msra.mxu0 %v35_v33  ;;  %v63_v52 = vld [vmem:[%s1596_s1 + $0x118] sm:$0xff]  ;;  %v78_v54 = vld [vmem:[%s1596_s1 + $0x190] sm:$0xff]  ;;  %v29_v57 = vld [vmem:[%s1596_s1 + $0x8] sm:$0xff] }
  0x14   :  { %906 = vmatprep.subr.mxu1 %v83_v34  ;;  %873 = vmatprep.subr.mxu0 %v50_v35  ;;  %v62_v56 = vld [vmem:[%s1596_s1 + $0x110] sm:$0xff]  ;;  %v77_v58 = vld [vmem:[%s1596_s1 + $0x188] sm:$0xff]  ;;  %v44_v59 = vld [vmem:[%s1596_s1 + $0x80] sm:$0xff] }
  0x15   :  { %907 = vmatpush3.msra.mxu1 %v67_v36  ;;  %874 = vmatpush3.msra.mxu0 %v34_v37  ;;  %v22_v60 = vld [vmem:[%s1595_s0 + $0x8] sm:$0xff]  ;;  %v28_v61 = vld [vmem:[%s1596_s1] sm:$0xff]  ;;  %v123_v1 = vld [vmem:[%s1596_s1 + $0x2f8] sm:$0xff] }
  0x16   :  { %908 = vmatprep.subr.mxu1 %v82_v38  ;;  %875 = vmatprep.subr.mxu0 %v49_v39  ;;  %v61_v62 = vld [vmem:[%s1596_s1 + $0x108] sm:$0xff]  ;;  %v21_v63 = vld [vmem:[%s1595_s0] sm:$0xff]  ;;  %v24_v3 = vld [vmem:[%s1595_s0 + $0x18] sm:$0xff] }
  0x17   :  { %909 = vmatpush3.msra.mxu1 %v66_v40  ;;  %876 = vmatpush3.msra.mxu0 %v33_v41  ;;  %v76_v0 = vld [vmem:[%s1596_s1 + $0x180] sm:$0xff]  ;;  %v107_v4 = vld [vmem:[%s1596_s1 + $0x278] sm:$0xff]  ;;  %v23_v5 = vld [vmem:[%s1595_s0 + $0x10] sm:$0xff] }
  0x18   :  { %910 = vmatprep.subr.mxu1 %v81_v42  ;;  %877 = vmatprep.subr.mxu0 %v48_v43  ;;  %v60_v2 = vld [vmem:[%s1596_s1 + $0x100] sm:$0xff]  ;;  %v122_v6 = vld [vmem:[%s1596_s1 + $0x2f0] sm:$0xff]  ;;  %v121_v8 = vld [vmem:[%s1596_s1 + $0x2e8] sm:$0xff] }
  0x19   :  { %911 = vmatpush3.msra.mxu1 %v65_v44  ;;  %878 = vmatpush3.msra.mxu0 %v32_v45  ;;  %v106_v7 = vld [vmem:[%s1596_s1 + $0x270] sm:$0xff]  ;;  %v139_v9 = vld [vmem:[%s1596_s1 + $0x378] sm:$0xff]  ;;  %v105_v10 = vld [vmem:[%s1596_s1 + $0x268] sm:$0xff] }
  0x1a   :  { %912 = vmatprep.subr.mxu1 %v80_v46  ;;  %879 = vmatprep.subr.mxu0 %v47_v47  ;;  %v120_v12 = vld [vmem:[%s1596_s1 + $0x2e0] sm:$0xff]  ;;  %v138_v13 = vld [vmem:[%s1596_s1 + $0x370] sm:$0xff]  ;;  %v119_v15 = vld [vmem:[%s1596_s1 + $0x2d8] sm:$0xff] }
  0x1b   :  { %913 = vmatpush3.msra.mxu1 %v64_v48  ;;  %880 = vmatpush3.msra.mxu0 %v31_v49  ;;  %v104_v14 = vld [vmem:[%s1596_s1 + $0x260] sm:$0xff]  ;;  %v137_v16 = vld [vmem:[%s1596_s1 + $0x368] sm:$0xff] }
  0x1c   :  { %914 = vmatprep.subr.mxu1 %v79_v50  ;;  %881 = vmatprep.subr.mxu0 %v46_v51 }
  0x1d   :  { %915 = vmatpush3.msra.mxu1 %v63_v52  ;;  %882 = vmatpush3.msra.mxu0 %v30_v53 }
  0x1e   :  { %916 = vmatprep.subr.mxu1 %v78_v54  ;;  %883 = vmatprep.subr.mxu0 %v45_v55 }
  0x1f   :  { %917 = vmatpush3.msra.mxu1 %v62_v56  ;;  %884 = vmatpush3.msra.mxu0 %v29_v57 }
  0x20   :  { %918 = vmatprep.subr.mxu1 %v77_v58  ;;  %885 = vmatprep.subr.mxu0 %v44_v59 }
  0x21   :  { %211 = vmatprep.mubr.f32.mxu0 %v22_v60  ;;  %886 = vmatpush3.msra.mxu0 %v28_v61 }
  0x22   :  { %919 = vmatpush3.msra.mxu1 %v61_v62  ;;  %212 = vmatmul.mubr.f32.vlgmr.msra.gmra.mxu0 %v21_v63 }
  0x23   :  { %920 = vmatprep.subr.mxu1 %v76_v0  ;;  %925 = vmatprep.subr.mxu0 %v123_v1 }
  0x24   :  { %921 = vmatpush3.msra.mxu1 %v60_v2  ;;  %281 = vmatprep.mubr.f32.mxu1 %v24_v3 }
  0x25   :  { %926 = vmatpush3.msra.mxu0 %v107_v4  ;;  %282 = vmatmul.mubr.f32.vlgmr.msra.gmra.mxu1 %v23_v5 }
  0x26   :  { %927 = vmatprep.subr.mxu0 %v122_v6  ;;  %982 = vmatprep.subr.mxu1 %v1081_v11 }
  0x27   :  { %928 = vmatpush3.msra.mxu0 %v106_v7  ;;  %983 = vmatpush3.msra.mxu1 %v139_v9 }
  0x28   :  { %929 = vmatprep.subr.mxu0 %v121_v8  ;;  %984 = vmatprep.subr.mxu1 %v1081_v11 }
  0x29   :  { %930 = vmatpush3.msra.mxu0 %v105_v10 }
  0x2a   :  { %10 = vsyncpa [#allocation3], 0  ;;  %931 = vmatprep.subr.mxu0 %v120_v12  ;;  %985 = vmatpush3.msra.mxu1 %v138_v13  ;;  %v103_v17 = vld [vmem:[%s1596_s1 + $0x258] sm:$0xff]  ;;  %v118_v18 = vld [vmem:[%s1596_s1 + $0x2d0] sm:$0xff]  ;;  %vm1082_vm0 = vmmov 0   ;;  %vm493_vm1 = vcmask 261120  }
  0x2b   :  { %932 = vmatpush3.msra.mxu0 %v104_v14  ;;  %986 = vmatprep.subr.mxu1 %v1081_v11  ;;  %v136_v19 = vld [vmem:[%s1596_s1 + $0x360] sm:$0xff]  ;;  %v102_v20 = vld [vmem:[%s1596_s1 + $0x250] sm:$0xff]  ;;  %v117_v21 = vld [vmem:[%s1596_s1 + $0x2c8] sm:$0xff] }
  0x2c   :  { %933 = vmatprep.subr.mxu0 %v119_v15  ;;  %987 = vmatpush3.msra.mxu1 %v137_v16  ;;  %v135_v22 = vld [vmem:[%s1596_s1 + $0x358] sm:$0xff]  ;;  %v101_v23 = vld [vmem:[%s1596_s1 + $0x248] sm:$0xff]  ;;  %v116_v24 = vld [vmem:[%s1596_s1 + $0x2c0] sm:$0xff] }
  0x2d   :  { %934 = vmatpush3.msra.mxu0 %v103_v17  ;;  %988 = vmatprep.subr.mxu1 %v1081_v11  ;;  %v134_v25 = vld [vmem:[%s1596_s1 + $0x350] sm:$0xff]  ;;  %v100_v26 = vld [vmem:[%s1596_s1 + $0x240] sm:$0xff]  ;;  %v115_v27 = vld [vmem:[%s1596_s1 + $0x2b8] sm:$0xff] }
  0x2e   :  { %935 = vmatprep.subr.mxu0 %v118_v18  ;;  %989 = vmatpush3.msra.mxu1 %v136_v19  ;;  %v133_v28 = vld [vmem:[%s1596_s1 + $0x348] sm:$0xff]  ;;  %v99_v29 = vld [vmem:[%s1596_s1 + $0x238] sm:$0xff]  ;;  %v114_v30 = vld [vmem:[%s1596_s1 + $0x2b0] sm:$0xff] }
  0x2f   :  { %936 = vmatpush3.msra.mxu0 %v102_v20  ;;  %990 = vmatprep.subr.mxu1 %v1081_v11  ;;  %v132_v31 = vld [vmem:[%s1596_s1 + $0x340] sm:$0xff]  ;;  %v98_v32 = vld [vmem:[%s1596_s1 + $0x230] sm:$0xff]  ;;  %v113_v33 = vld [vmem:[%s1596_s1 + $0x2a8] sm:$0xff] }
  0x30   :  { %937 = vmatprep.subr.mxu0 %v117_v21  ;;  %991 = vmatpush3.msra.mxu1 %v135_v22  ;;  %v131_v34 = vld [vmem:[%s1596_s1 + $0x338] sm:$0xff]  ;;  %v97_v35 = vld [vmem:[%s1596_s1 + $0x228] sm:$0xff]  ;;  %v112_v36 = vld [vmem:[%s1596_s1 + $0x2a0] sm:$0xff] }
  0x31   :  { %938 = vmatpush3.msra.mxu0 %v101_v23  ;;  %992 = vmatprep.subr.mxu1 %v1081_v11  ;;  %v130_v37 = vld [vmem:[%s1596_s1 + $0x330] sm:$0xff]  ;;  %v96_v38 = vld [vmem:[%s1596_s1 + $0x220] sm:$0xff]  ;;  %v111_v39 = vld [vmem:[%s1596_s1 + $0x298] sm:$0xff] }
  0x32   :  { %939 = vmatprep.subr.mxu0 %v116_v24  ;;  %993 = vmatpush3.msra.mxu1 %v134_v25  ;;  %v129_v40 = vld [vmem:[%s1596_s1 + $0x328] sm:$0xff]  ;;  %v95_v41 = vld [vmem:[%s1596_s1 + $0x218] sm:$0xff]  ;;  %v110_v42 = vld [vmem:[%s1596_s1 + $0x290] sm:$0xff] }
  0x33   :  { %940 = vmatpush3.msra.mxu0 %v100_v26  ;;  %994 = vmatprep.subr.mxu1 %v1081_v11  ;;  %v128_v43 = vld [vmem:[%s1596_s1 + $0x320] sm:$0xff]  ;;  %v94_v44 = vld [vmem:[%s1596_s1 + $0x210] sm:$0xff]  ;;  %v109_v45 = vld [vmem:[%s1596_s1 + $0x288] sm:$0xff] }
  0x34   :  { %941 = vmatprep.subr.mxu0 %v115_v27  ;;  %995 = vmatpush3.msra.mxu1 %v133_v28  ;;  %v127_v46 = vld [vmem:[%s1596_s1 + $0x318] sm:$0xff]  ;;  %v93_v47 = vld [vmem:[%s1596_s1 + $0x208] sm:$0xff]  ;;  %v108_v48 = vld [vmem:[%s1596_s1 + $0x280] sm:$0xff] }
  0x35   :  { %942 = vmatpush3.msra.mxu0 %v99_v29  ;;  %996 = vmatprep.subr.mxu1 %v1081_v11  ;;  %v26_v49 = vld [vmem:[%s1595_s0 + $0x28] sm:$0xff]  ;;  %v92_v50 = vld [vmem:[%s1596_s1 + $0x200] sm:$0xff]  ;;  %v126_v51 = vld [vmem:[%s1596_s1 + $0x310] sm:$0xff] }
  0x36   :  { %943 = vmatprep.subr.mxu0 %v114_v30  ;;  %997 = vmatpush3.msra.mxu1 %v132_v31  ;;  %v25_v52 = vld [vmem:[%s1595_s0 + $0x20] sm:$0xff]  ;;  %v125_v53 = vld [vmem:[%s1596_s1 + $0x308] sm:$0xff]  ;;  %v27_v55 = vld [vmem:[%s1595_s0 + $0x30] sm:$0xff] }
  0x37   :  { %944 = vmatpush3.msra.mxu0 %v98_v32  ;;  %998 = vmatprep.subr.mxu1 %v1081_v11  ;;  %v124_v54 = vld [vmem:[%s1596_s1 + $0x300] sm:$0xff]  ;;  %v450_v56 = vld [vmem:[%s1598_s3 + $0xb0] sm:$0xff]  ;;  %v449_v58 = vld [vmem:[%s1598_s3 + $0xa8] sm:$0xff] }
  0x38   :  { %945 = vmatprep.subr.mxu0 %v113_v33  ;;  %999 = vmatpush3.msra.mxu1 %v131_v34  ;;  %v452_v57 = vld [vmem:[%s1598_s3 + $0xc0] sm:$0xff]  ;;  %v451_v59 = vld [vmem:[%s1598_s3 + $0xb8] sm:$0xff]  ;;  %v445_v61 = vld [vmem:[%s1598_s3 + $0x88] sm:$0xff] }
  0x39   :  { %946 = vmatpush3.msra.mxu0 %v97_v35  ;;  %1000 = vmatprep.subr.mxu1 %v1081_v11  ;;  %v443_v60 = vld [vmem:[%s1598_s3 + $0x78] sm:$0xff]  ;;  %v442_v62 = vld [vmem:[%s1598_s3 + $0x70] sm:$0xff]  ;;  %v444_v63 = vld [vmem:[%s1598_s3 + $0x80] sm:$0xff] }
  0x3a   :  { %947 = vmatprep.subr.mxu0 %v112_v36  ;;  %1001 = vmatpush3.msra.mxu1 %v130_v37  ;;  %v436_v0 = vld [vmem:[%s1598_s3 + $0x40] sm:$0xff]  ;;  %v438_v1 = vld [vmem:[%s1598_s3 + $0x50] sm:$0xff]  ;;  %v435_v2 = vld [vmem:[%s1598_s3 + $0x38] sm:$0xff] }
  0x3b   :  { %948 = vmatpush3.msra.mxu0 %v96_v38  ;;  %1002 = vmatprep.subr.mxu1 %v1081_v11  ;;  %v437_v3 = vld [vmem:[%s1598_s3 + $0x48] sm:$0xff]  ;;  %v431_v5 = vld [vmem:[%s1598_s3 + $0x18] sm:$0xff]  ;;  %v428_v6 = vld [vmem:[%s1598_s3] sm:$0xff]  ;;  %v458_v38 = vlaneseq }
  0x3c   :  { %949 = vmatprep.subr.mxu0 %v111_v39  ;;  %1003 = vmatpush3.msra.mxu1 %v129_v40  ;;  %v429_v4 = vld [vmem:[%s1598_s3 + $0x8] sm:$0xff]  ;;  %v430_v7 = vld [vmem:[%s1598_s3 + $0x10] sm:$0xff]  ;;  %v843_v14 = vld [vmem:[%s1597_s2] ss:$0 sm:$0xff] }
  0x3d   :  { %950 = vmatpush3.msra.mxu0 %v95_v41  ;;  %1004 = vmatprep.subr.mxu1 %v1081_v11  ;;  %v454_v8 = vld [vmem:[%s1598_s3 + $0xd0] sm:$0xff]  ;;  %v453_v27 = vld [vmem:[%s1598_s3 + $0xc8] sm:$0xff]  ;;  %v455_v28 = vld [vmem:[%s1598_s3 + $0xd8] sm:$0xff]  ;;  %v459_v39 = vshrl.u32 %v458_v38, 7 }
  0x3e   :  { %951 = vmatprep.subr.mxu0 %v110_v42  ;;  %1005 = vmatpush3.msra.mxu1 %v128_v43  ;;  %v447_v29 = vld [vmem:[%s1598_s3 + $0x98] sm:$0xff]  ;;  %v446_v30 = vld [vmem:[%s1598_s3 + $0x90] sm:$0xff]  ;;  %v448_v31 = vld [vmem:[%s1598_s3 + $0xa0] sm:$0xff] }
  0x3f   :  { %952 = vmatpush3.msra.mxu0 %v94_v44  ;;  %1006 = vmatprep.subr.mxu1 %v1081_v11  ;;  %v440_v32 = vld [vmem:[%s1598_s3 + $0x60] sm:$0xff]  ;;  %v439_v33 = vld [vmem:[%s1598_s3 + $0x58] sm:$0xff]  ;;  %v441_v34 = vld [vmem:[%s1598_s3 + $0x68] sm:$0xff]  ;;  %v460_v40 = vsub.s32 0, %v459_v39  ;;  %v468_v41 = vsub.s32 2, %v459_v39  ;;  %v464_v43 = vsub.s32 1, %v459_v39 }
  0x40   :  { %953 = vmatprep.subr.mxu0 %v109_v45  ;;  %1007 = vmatpush3.msra.mxu1 %v127_v46  ;;  %v433_v35 = vld [vmem:[%s1598_s3 + $0x28] sm:$0xff]  ;;  %v432_v36 = vld [vmem:[%s1598_s3 + $0x20] sm:$0xff]  ;;  %v434_v37 = vld [vmem:[%s1598_s3 + $0x30] sm:$0xff]  ;;  %v472_v44 = vsub.s32 3, %v459_v39 }
  0x41   :  { %954 = vmatpush3.msra.mxu0 %v93_v47  ;;  %1008 = vmatprep.subr.mxu1 %v1081_v11  ;;  %v456_v42 = vld [vmem:[%s1599_s4] sm:$0xff]  ;;  %s1083_s4 = smov [#allocation2]  }
  0x42   :  { %955 = vmatprep.subr.mxu0 %v108_v48  ;;  %351 = vmatprep.mubr.f32.mxu0 %v26_v49  ;;  %v461_v45 = vrot.slane %v456_v42, %v460_v40  ;;  %v469_v46 = vrot.slane %v456_v42, %v468_v41  ;;  %v465_v47 = vrot.slane %v456_v42, %v464_v43  ;;  %s835_s9 = sshll.u32 %s1083_s4, 4  ;;  %s836_s9 = int_to_ptr.vmem [resolvable:$true] %s835_s9 }
  0x43   :  { %956 = vmatpush3.msra.mxu0 %v92_v50  ;;  %1009 = vmatpush3.msra.mxu1 %v126_v51  ;;  %v473_v48 = vrot.slane %v456_v42, %v472_v44  ;;  %s1059_s0 = scalar_lea.vmem %s836_s9, 896  ;;  %p1064_p1 = scmp.lt.s32.totalorder %s836_s9, %s836_s9 }
  0x44   :  { %352 = vmatmul.mubr.f32.vlgmr.msra.gmra.mxu0 %v25_v52  ;;  %1010 = vmatprep.subr.mxu1 %v1081_v11  ;;  %p1060_p0 = scmp.ne.s32.totalorder %s836_s9, %s1059_s0  ;;  %p1065_p2 = scmp.lt.s32.totalorder %s1059_s0, %s1059_s0 }
  0x45   :  { %1011 = vmatpush3.msra.mxu1 %v125_v53  ;;  %1014 = vmatprep.mubr.msk.f32.mxu1 %vm1082_vm0, %v1081_v11 }
  0x46   :  { %1012 = vmatprep.subr.mxu1 %v1081_v11  ;;  %561 = vmatprep.mubr.f32.mxu0 %v1081_v11  ;;  %p1066_p3 = por %p1065_p2, %p1064_p1 }
  0x47   :  { %1013 = vmatpush3.msra.mxu1 %v124_v54  ;;  %521 = vmatprep.subr.mxu0 %v450_v56  ;;  %v476_v54 = vsub.s32 4, %v459_v39 }
  0x48   :  { %1015 = vmatmul.mubr.f32.vlgmr.msra.gmra.mxu1 %v27_v55  ;;  %592 = vmatprep.subr.mxu1 %v452_v57  ;;  %v484_v55 = vsub.s32 6, %v459_v39  ;;  %p1067_p4 = pnand %p1066_p3, %p1060_p0 }
  0x49   :  { %632 = vmatprep.mubr.f32.mxu1 %v1081_v11  ;;  %522 = vmatpush1.msra.mxu0 %v449_v58 }
  0x4a   :  { %593 = vmatpush1.msra.mxu1 %v451_v59  ;;  %523 = vmatprep.subr.mxu0 %v443_v60  ;;  %v480_v60 = vsub.s32 5, %v459_v39 }
  0x4b   :  { %594 = vmatprep.subr.mxu1 %v445_v61  ;;  %524 = vmatpush1.msra.mxu0 %v442_v62 }
  0x4c   :  { %595 = vmatpush1.msra.mxu1 %v444_v63  ;;  %525 = vmatprep.subr.mxu0 %v436_v0  ;;  %v477_v63 = vrot.slane %v456_v42, %v476_v54  ;;  %v485_v0 = vrot.slane %v456_v42, %v484_v55 }
  0x4d   :  { %596 = vmatprep.subr.mxu1 %v438_v1  ;;  %526 = vmatpush1.msra.mxu0 %v435_v2  ;;  %v481_v1 = vrot.slane %v456_v42, %v480_v60 }
  0x4e   :  { %597 = vmatpush1.msra.mxu1 %v437_v3  ;;  %527 = vmatprep.subr.mxu0 %v429_v4 }
  0x4f   :  { %598 = vmatprep.subr.mxu1 %v431_v5  ;;  %528 = vmatpush1.msra.mxu0 %v428_v6 }
  0x50   :  { %599 = vmatpush1.msra.mxu1 %v430_v7  ;;  %663 = vmatprep.subr.mxu0 %v454_v8 }
  0x51   :  { %1017 = vmatprep.subr.mxu1 %v1081_v11 }
  0xe2   :  { %v887_v9 = vpop.f32.mrf.mxu0 }
  0xe4   :  { %v888_v10 = vpop.f32.mrf.mxu0 }
  0xe5   :  { %v922_v12 = vpop.f32.mrf.mxu1  ;;  %v889_v13 = vadd.f32 %v888_v10, %v887_v9 }
  0xe7   :  { %v923_v15 = vpop.f32.mrf.mxu1  ;;  %v214_v16 = vadd.f32 %v889_v13, %v843_v14 }
  0xe8   :  { %v924_v17 = vadd.f32 %v923_v15, %v922_v12 }
  0xea   :  { %v284_v20 = vadd.f32 %v924_v17, %v214_v16 }
 0x104   :  { %v957_v18 = vpop.f32.mrf.mxu0 }
 0x106   :  { %v958_v19 = vpop.f32.mrf.mxu0 }
 0x107   :  { %v959_v21 = vadd.f32 %v958_v19, %v957_v18 }
 0x108   :  { %v423_v22 = vpop.f32.mrf.mxu1 }
 0x109   :  { %v354_v23 = vadd.f32 %v959_v21, %v284_v20 }
 0x10a   :  { %v1016_v24 = vpop.f32.mrf.mxu1 }
 0x10b   :  { %v424_v25 = vadd.f32 %v423_v22, %v354_v23 }
 0x10d   :  { %v427_v26 = vmax.f32 %v424_v25, 0.0 }
 0x10f   :  { %844 = vmatmul.mubr.msk.f32.vlgmr.msra.gmra.mxu0 %vm493_vm1, %v427_v26  ;;  %845 = vmatmul.mubr.msk.f32.vlgmr.msra.gmra.mxu1 %vm493_vm1, %v427_v26 }
 0x110   :  { %664 = vmatpush1.msra.mxu0 %v453_v27  ;;  %1018 = vmatpush3.msra.mxu1 %v455_v28 }
 0x111   :  { %665 = vmatprep.subr.mxu0 %v447_v29  ;;  %1019 = vmatprep.subr.mxu1 %v1081_v11 }
 0x112   :  { %666 = vmatpush1.msra.mxu0 %v446_v30  ;;  %1020 = vmatpush3.msra.mxu1 %v448_v31 }
 0x113   :  { %667 = vmatprep.subr.mxu0 %v440_v32  ;;  %1021 = vmatprep.subr.mxu1 %v1081_v11 }
 0x114   :  { %668 = vmatpush1.msra.mxu0 %v439_v33  ;;  %1022 = vmatpush3.msra.mxu1 %v441_v34 }
 0x115   :  { %669 = vmatprep.subr.mxu0 %v433_v35  ;;  %1023 = vmatprep.subr.mxu1 %v1081_v11 }
 0x116   :  { %670 = vmatpush1.msra.mxu0 %v432_v36  ;;  %703 = vmatprep.mubr.f32.mxu0 %v1081_v11 }
 0x117   :  { %1024 = vmatpush3.msra.mxu1 %v434_v37  ;;  %1025 = vmatprep.mubr.msk.f32.mxu1 %vm1082_vm0, %v1081_v11 }
 0x118   :  { %846 = vmatmul.mubr.msk.f32.vlgmr.msra.gmra.mxu0 %vm493_vm1, %v427_v26  ;;  %1026 = vmatmul.mubr.msk.f32.vlgmr.msra.gmra.mxu1 %vm493_vm1, %v427_v26 }
 0x1cf   :  { %v563_v49 = vpop.f32.mrf.mxu0  ;;  %v634_v11 = vpop.f32.mrf.mxu1 }
 0x1d0   :  { %v564_v50 = vadd.f32 %v563_v49, %v461_v45  ;;  %v635_v51 = vadd.f32 %v634_v11, %v469_v46 }
 0x1d1   :  { %v565_v52 = vpop.f32.mrf.mxu0  ;;  %v636_v53 = vpop.f32.mrf.mxu1 }
 0x1d2   :  { %v848_v56 = vmul.f32 -1.442695, %v564_v50  ;;  %v850_v57 = vmul.f32 -1.442695, %v635_v51  ;;  %v566_v58 = vadd.f32 %v565_v52, %v465_v47  ;;  %v637_v59 = vadd.f32 %v636_v53, %v473_v48 }
 0x1d4   :  { %1031 = vpow2.f32 %v848_v56  ;;  %v849_v61 = vmul.f32 -1.442695, %v566_v58  ;;  %v851_v62 = vmul.f32 -1.442695, %v637_v59 }
 0x1d5   :  { %1033 = vpow2.f32 %v850_v57 }
 0x1d6   :  { %1035 = vpow2.f32 %v849_v61 }
 0x1d7   :  { %1037 = vpow2.f32 %v851_v62 }
 0x1d8   :  { %v705_v2 = vpop.f32.mrf.mxu0  ;;  %v776_v3 = vpop.f32.mrf.mxu1 }
 0x1d9   :  { %v706_v4 = vadd.f32 %v705_v2, %v477_v63  ;;  %v777_v5 = vadd.f32 %v776_v3, %v485_v0 }
 0x1da   :  { %v707_v6 = vpop.f32.mrf.mxu0  ;;  %v1027_v7 = vpop.f32.mrf.mxu1 }
 0x1db   :  { %v852_v8 = vmul.f32 -1.442695, %v706_v4  ;;  %v854_v9 = vmul.f32 -1.442695, %v777_v5  ;;  %v708_v10 = vadd.f32 %v707_v6, %v481_v1 }
 0x1dd   :  { %1039 = vpow2.f32 %v852_v8  ;;  %v853_v12 = vmul.f32 -1.442695, %v708_v10 }
 0x1de   :  { %1041 = vpow2.f32 %v854_v9 }
 0x1df   :  { %1043 = vpow2.f32 %v853_v12 }
 0x1e1   :  { %v1032_v13 = vpop.eup %1031 }
 0x1e2   :  { %v1034_v14 = vpop.eup %1033  ;;  %v801_v15 = vadd.f32 1.0, %v1032_v13 }
 0x1e3   :  { %v1036_v16 = vpop.eup %1035  ;;  %v803_v17 = vadd.f32 1.0, %v1034_v14 }
 0x1e4   :  { %v1038_v18 = vpop.eup %1037  ;;  %1045 = vrcp.f32 %v801_v15  ;;  %v802_v19 = vadd.f32 1.0, %v1036_v16 }
 0x1e5   :  { %1047 = vrcp.f32 %v803_v17  ;;  %v804_v20 = vadd.f32 1.0, %v1038_v18 }
 0x1e6   :  { %1049 = vrcp.f32 %v802_v19 }
 0x1e7   :  { %1051 = vrcp.f32 %v804_v20 }
 0x1ea   :  { %v1040_v21 = vpop.eup %1039 }
 0x1eb   :  { %v1042_v22 = vpop.eup %1041  ;;  %v805_v23 = vadd.f32 1.0, %v1040_v21 }
 0x1ec   :  { %v1044_v24 = vpop.eup %1043  ;;  %v807_v25 = vadd.f32 1.0, %v1042_v22 }
 0x1ed   :  { %1053 = vrcp.f32 %v805_v23  ;;  %v806_v26 = vadd.f32 1.0, %v1044_v24 }
 0x1ee   :  { %1055 = vrcp.f32 %v807_v25 }
 0x1ef   :  { %1057 = vrcp.f32 %v806_v26 }
 0x1f1   :  { %v1046_v27 = vpop.eup %1045 }
 0x1f2   :  { %v1048_v28 = vpop.eup %1047  ;;  %822 = vst [vmem:[#allocation2] sm:$0xff] %v1046_v27 }
 0x1f3   :  { %v1050_v29 = vpop.eup %1049  ;;  %824 = vst [vmem:[#allocation2 + $0x10] sm:$0xff] %v1048_v28 }
 0x1f4   :  { %v1052_v30 = vpop.eup %1051  ;;  %823 = vst [vmem:[#allocation2 + $0x8] sm:$0xff] %v1050_v29 }
 0x1f5   :  { %825 = vst [vmem:[#allocation2 + $0x18] sm:$0xff] %v1052_v30 }
 0x1fa   :  { %v1054_v31 = vpop.eup %1053 }
 0x1fb   :  { %v1056_v32 = vpop.eup %1055  ;;  %826 = vst [vmem:[#allocation2 + $0x20] sm:$0xff] %v1054_v31 }
 0x1fc   :  { %v1058_v33 = vpop.eup %1057  ;;  %828 = vst [vmem:[#allocation2 + $0x30] sm:$0xff] %v1056_v32 }
 0x1fd   :  { %827 = vst [vmem:[#allocation2 + $0x28] sm:$0xff] %v1058_v33 }
 0x1fe   :  { %1070 = shalt.err (!%p1067_p4)
}
 0x1ff   :  { %838 = dma.vmem_to_hbm [thread:$0]  %s836_s9, 896, %s1600_s5, [#allocation3]  }
 0x200   :  { %1079 = dma.done.wait [#allocation3], 896  }
 0x201   :  { %1080 = vsyncadd [#allocation3], 4294966400 }
 0x202   :  { %842 = vsyncpa [#allocation3], 1 }

</bundles_post_ra>
